<compile_context>
chip_gen: v7x
topology: tpu7x:2x2x1
jax: 0.10.0
libtpu: 0.0.40
codegen_flags: <defaults>
</compile_context>

<pallas_src>
import functools

import jax
import jax.numpy as jnp
from jax.experimental import pallas as pl
from jax.experimental.pallas import tpu as pltpu

BN_EPS = 1e-5


def _band_weights(w_hwio, W):
    """Fold the kw taps + width zero-padding of a 3x3 conv into per-kh bands.

    Returns A of shape (3, W*Cin, W*Cout) with
        A[kh, wi*Cin + ci, wo*Cout + co] = w_hwio[kh, wi - wo + 1, ci, co]
    when 0 <= wi - wo + 1 < 3, else 0.  Then
        y[:, h, wo, co] = sum_kh  x_rowshift(kh)[:, h, :, :] . A[kh]
    reproduces the padding=1 conv.
    """
    KH, KW, Ci, Co = w_hwio.shape
    wi = jnp.arange(W)[:, None]                       # input column
    wo = jnp.arange(W)[None, :]                       # output column
    kw = wi - wo + 1                                  # (W, W)
    valid = (kw >= 0) & (kw < KW)
    g = w_hwio[:, jnp.clip(kw, 0, KW - 1), :, :]      # (KH, W, W, Ci, Co)
    g = jnp.where(valid[None, :, :, None, None], g, 0.0)
    return jnp.transpose(g, (0, 1, 3, 2, 4)).reshape(KH, W * Ci, W * Co)


def unet_block_kernel(x_ref, w1_ref, b1_ref, g1_ref, be1_ref,
                      w2_ref, b2_ref, g2_ref, be2_ref, proj_ref,
                      out_ref, *, inv_samples):
    f32 = jnp.float32

    def row_shifted(v3):
        # v3: (N, H, C) lane-dense rows.  Returns (row h-1, row h, row h+1)
        # with zero rows at image boundaries (height padding, no scratch).
        n, hh, c = v3.shape
        zr = jnp.zeros((n, 1, c), f32)
        up = jnp.concatenate([zr, v3[:, :hh - 1, :]], axis=1)
        dn = jnp.concatenate([v3[:, 1:, :], zr], axis=1)
        return up, v3, dn

    def conv3x3(v3, w_ref, b_row):
        # 3 accumulating matmuls (kh taps); kw taps + W-padding live in w_ref.
        n, hh, c = v3.shape
        up, mid, dn = row_shifted(v3)
        acc = jnp.dot(up.reshape(n * hh, c), w_ref[0],
                      preferred_element_type=f32)
        acc = acc + jnp.dot(mid.reshape(n * hh, c), w_ref[1],
                            preferred_element_type=f32)
        acc = acc + jnp.dot(dn.reshape(n * hh, c), w_ref[2],
                            preferred_element_type=f32)
        return acc + b_row                             # (N*H, W*Cout)

    def relu_bn(a, g_row, be_row):
        a = jnp.maximum(a, 0.0)
        # single pass: per-lane sum and sum-of-squares
        s1 = jnp.sum(a, axis=0, keepdims=True)         # (1, W*Cout)
        s2 = jnp.sum(a * a, axis=0, keepdims=True)
        st = jnp.concatenate([s1, s2], axis=0)         # (2, W*Cout)
        # channel-group reduction across the W lane groups; result is already
        # broadcast back across lanes (proj[l, l'] = 1 iff same channel).
        stc = jnp.dot(st, proj_ref[...], preferred_element_type=f32)
        mean = stc[0:1, :] * inv_samples
        var = jnp.maximum(stc[1:2, :] * inv_samples - mean * mean, 0.0)
        scale = g_row * jax.lax.rsqrt(var + BN_EPS)
        shift = be_row - mean * scale
        return a * scale + shift

    x3 = x_ref[...].astype(f32)                        # (N, H, W*Cin)
    n, hh, _ = x3.shape

    a1 = conv3x3(x3, w1_ref, b1_ref[...])              # (N*H, W*Cout)
    h1 = relu_bn(a1, g1_ref[...], be1_ref[...])

    a2 = conv3x3(h1.reshape(n, hh, -1), w2_ref, b2_ref[...])
    h2 = relu_bn(a2, g2_ref[...], be2_ref[...])

    out_ref[...] = h2                                  # full-lane (32,128) store


@jax.jit
def unet_block_forward(x_nchw, w1, b1, g1, be1, w2, b2, g2, be2):
    """x_nchw: (N, Cin, H, W) float32. Conv weights are HWIO: (3,3,Cin/out,Cout)."""
    N, Cin, H, W = x_nchw.shape
    Cout = b1.shape[0]
    f32 = jnp.float32

    # ---- wrapper glue (layout + parameter folding, plain JAX) ----
    x = jnp.transpose(x_nchw, (0, 2, 3, 1)).astype(f32).reshape(N, H, W * Cin)
    w1b = _band_weights(w1.astype(f32), W)             # (3, W*Cin,  W*Cout)
    w2b = _band_weights(w2.astype(f32), W)             # (3, W*Cout, W*Cout)
    tile = lambda v: jnp.tile(v.astype(f32), W).reshape(1, W * Cout)
    lane = jnp.arange(W * Cout)
    proj = (lane[:, None] % Cout == lane[None, :] % Cout).astype(f32)  # (WC, WC)

    kernel = functools.partial(unet_block_kernel,
                               inv_samples=1.0 / float(N * H * W))

    vmem = pl.BlockSpec(memory_space=pltpu.MemorySpace.VMEM)
    out2d = pl.pallas_call(
        kernel,
        out_shape=jax.ShapeDtypeStruct((N * H, W * Cout), f32),
        in_specs=[vmem] * 10,
        out_specs=vmem,
        compiler_params=pltpu.CompilerParams(vmem_limit_bytes=32 * 1024 * 1024),
    )(x, w1b, tile(b1), tile(g1), tile(be1),
      w2b, tile(b2), tile(g2), tile(be2), proj)

    # lane-dense (N*H, W*Cout) -> NCHW
    return jnp.transpose(out2d.reshape(N, H, W, Cout), (0, 3, 1, 2))


def reference_forward(x_nchw, w1, b1, g1, be1, w2, b2, g2, be2):
    """Pure-JAX reference (same math as PyTorch UnetBlock in training mode)."""
    x = jnp.transpose(x_nchw, (0, 2, 3, 1)).astype(jnp.float32)

    def conv(h, w, b):
        y = jax.lax.conv_general_dilated(
            h, w, window_strides=(1, 1), padding="SAME",
            dimension_numbers=("NHWC", "HWIO", "NHWC"))
        return y + b.reshape(1, 1, 1, -1)

    def bn(h, g, be):
        m = h.mean(axis=(0, 1, 2), keepdims=True)
        v = ((h - m) ** 2).mean(axis=(0, 1, 2), keepdims=True)
        return (h - m) / jnp.sqrt(v + BN_EPS) * g.reshape(1, 1, 1, -1) + be.reshape(1, 1, 1, -1)

    h = bn(jnp.maximum(conv(x, w1, b1), 0.0), g1, be1)
    h = bn(jnp.maximum(conv(h, w2, b2), 0.0), g2, be2)
    return jnp.transpose(h, (0, 3, 1, 2))


if __name__ == "__main__":
    # Small shapes consistent with the module: batch=2, in_channels=4,
    # out_channels=8, spatial 16x16 (W*Cout = 128 -> one full lane width).
    N, Cin, Cout, H, W = 2, 4, 8, 16, 16

    key = jax.random.PRNGKey(0)
    ks = jax.random.split(key, 9)
    x = jax.random.normal(ks[0], (N, Cin, H, W), jnp.float32)

    # Deterministic parameter init (HWIO conv weights; PyTorch's OIHW would be
    # transpose(2, 3, 1, 0) of these).
    w1 = 0.2 * jax.random.normal(ks[1], (3, 3, Cin, Cout), jnp.float32)
    b1 = 0.1 * jax.random.normal(ks[2], (Cout,), jnp.float32)
    w2 = 0.2 * jax.random.normal(ks[3], (3, 3, Cout, Cout), jnp.float32)
    b2 = 0.1 * jax.random.normal(ks[4], (Cout,), jnp.float32)
    g1 = 1.0 + 0.3 * jax.random.normal(ks[5], (Cout,), jnp.float32)
    be1 = 0.1 * jax.random.normal(ks[6], (Cout,), jnp.float32)
    g2 = 1.0 + 0.3 * jax.random.normal(ks[7], (Cout,), jnp.float32)
    be2 = 0.1 * jax.random.normal(ks[8], (Cout,), jnp.float32)

    params = (w1, b1, g1, be1, w2, b2, g2, be2)

    out = unet_block_forward(x, *params)
    jax.block_until_ready(out)

    ref = reference_forward(x, *params)
    assert out.shape == (N, Cout, H, W), out.shape
    assert jnp.allclose(out, ref, atol=1e-3, rtol=1e-3), (
        float(jnp.max(jnp.abs(out - ref))))

    print("KERNEL_OK")
</pallas_src>

<mosaic_0001>
module attributes {stable_mosaic.version = 11 : i64} {
  func.func @unet_block_kernel(%arg0: memref<2x16x64xf32, #tpu.memory_space<vmem>>, %arg1: memref<3x64x128xf32, #tpu.memory_space<vmem>>, %arg2: memref<1x128xf32, #tpu.memory_space<vmem>>, %arg3: memref<1x128xf32, #tpu.memory_space<vmem>>, %arg4: memref<1x128xf32, #tpu.memory_space<vmem>>, %arg5: memref<3x128x128xf32, #tpu.memory_space<vmem>>, %arg6: memref<1x128xf32, #tpu.memory_space<vmem>>, %arg7: memref<1x128xf32, #tpu.memory_space<vmem>>, %arg8: memref<1x128xf32, #tpu.memory_space<vmem>>, %arg9: memref<128x128xf32, #tpu.memory_space<vmem>>, %arg10: memref<32x128xf32, #tpu.memory_space<vmem>>) attributes {dimension_semantics = [], scalar_prefetch = 0 : i64, scratch_operands = 0 : i64, tpu.core_type = #tpu.core_type<tc>} {
    %c0 = arith.constant 0 : index
    %c0_0 = arith.constant 0 : index
    %c0_1 = arith.constant 0 : index
    %0 = vector.load %arg0[%c0, %c0_0, %c0_1] : memref<2x16x64xf32, #tpu.memory_space<vmem>>, vector<2x16x64xf32>
    %c0_2 = arith.constant 0 : index
    %c0_3 = arith.constant 0 : index
    %1 = vector.load %arg2[%c0_2, %c0_3] : memref<1x128xf32, #tpu.memory_space<vmem>>, vector<1x128xf32>
    %cst = arith.constant 0.000000e+00 : f32
    %2 = vector.broadcast %cst : f32 to vector<2x1x64xf32>
    %3 = vector.extract_strided_slice %0 {offsets = [0, 0, 0], sizes = [2, 15, 64], strides = [1, 1, 1]} : vector<2x16x64xf32> to vector<2x15x64xf32>
    %4 = tpu.concatenate %2, %3 in 1 : vector<2x1x64xf32>, vector<2x15x64xf32> -> vector<2x16x64xf32>
    %5 = vector.extract_strided_slice %0 {offsets = [0, 1, 0], sizes = [2, 15, 64], strides = [1, 1, 1]} : vector<2x16x64xf32> to vector<2x15x64xf32>
    %6 = tpu.concatenate %5, %2 in 1 : vector<2x15x64xf32>, vector<2x1x64xf32> -> vector<2x16x64xf32>
    %7 = vector.shape_cast %4 : vector<2x16x64xf32> to vector<32x64xf32>
    %c0_4 = arith.constant 0 : index
    %c0_5 = arith.constant 0 : index
    %c0_6 = arith.constant 0 : index
    %8 = vector.load %arg1[%c0_4, %c0_5, %c0_6] : memref<3x64x128xf32, #tpu.memory_space<vmem>>, vector<1x64x128xf32>
    %9 = vector.shape_cast %8 : vector<1x64x128xf32> to vector<64x128xf32>
    %cst_7 = arith.constant dense<0.000000e+00> : vector<32x128xf32>
    %10 = tpu.matmul %7, %9, %cst_7 {dimension_numbers = #tpu.dot_dimension_numbers<[1], [0], [0], [1], [0, 0, 1, 1], [], []>} : vector<32x64xf32>, vector<64x128xf32>, vector<32x128xf32> -> vector<32x128xf32>
    %11 = vector.shape_cast %0 : vector<2x16x64xf32> to vector<32x64xf32>
    %c1 = arith.constant 1 : index
    %c0_8 = arith.constant 0 : index
    %c0_9 = arith.constant 0 : index
    %12 = vector.load %arg1[%c1, %c0_8, %c0_9] : memref<3x64x128xf32, #tpu.memory_space<vmem>>, vector<1x64x128xf32>
    %13 = vector.shape_cast %12 : vector<1x64x128xf32> to vector<64x128xf32>
    %cst_10 = arith.constant dense<0.000000e+00> : vector<32x128xf32>
    %14 = tpu.matmul %11, %13, %cst_10 {dimension_numbers = #tpu.dot_dimension_numbers<[1], [0], [0], [1], [0, 0, 1, 1], [], []>} : vector<32x64xf32>, vector<64x128xf32>, vector<32x128xf32> -> vector<32x128xf32>
    %15 = arith.addf %10, %14 : vector<32x128xf32>
    %16 = vector.shape_cast %6 : vector<2x16x64xf32> to vector<32x64xf32>
    %c2 = arith.constant 2 : index
    %c0_11 = arith.constant 0 : index
    %c0_12 = arith.constant 0 : index
    %17 = vector.load %arg1[%c2, %c0_11, %c0_12] : memref<3x64x128xf32, #tpu.memory_space<vmem>>, vector<1x64x128xf32>
    %18 = vector.shape_cast %17 : vector<1x64x128xf32> to vector<64x128xf32>
    %cst_13 = arith.constant dense<0.000000e+00> : vector<32x128xf32>
    %19 = tpu.matmul %16, %18, %cst_13 {dimension_numbers = #tpu.dot_dimension_numbers<[1], [0], [0], [1], [0, 0, 1, 1], [], []>} : vector<32x64xf32>, vector<64x128xf32>, vector<32x128xf32> -> vector<32x128xf32>
    %20 = arith.addf %15, %19 : vector<32x128xf32>
    %21 = vector.broadcast %1 : vector<1x128xf32> to vector<32x128xf32>
    %22 = arith.addf %20, %21 : vector<32x128xf32>
    %c0_14 = arith.constant 0 : index
    %c0_15 = arith.constant 0 : index
    %23 = vector.load %arg3[%c0_14, %c0_15] : memref<1x128xf32, #tpu.memory_space<vmem>>, vector<1x128xf32>
    %c0_16 = arith.constant 0 : index
    %c0_17 = arith.constant 0 : index
    %24 = vector.load %arg4[%c0_16, %c0_17] : memref<1x128xf32, #tpu.memory_space<vmem>>, vector<1x128xf32>
    %cst_18 = arith.constant 0.000000e+00 : f32
    %25 = vector.broadcast %cst_18 : f32 to vector<32x128xf32>
    %26 = arith.maximumf %22, %25 : vector<32x128xf32>
    %cst_19 = arith.constant dense<0.000000e+00> : vector<128xf32>
    %27 = vector.multi_reduction <add>, %26, %cst_19 [0] : vector<32x128xf32> to vector<128xf32>
    %28 = vector.shape_cast %27 : vector<128xf32> to vector<1x128xf32>
    %29 = arith.mulf %26, %26 : vector<32x128xf32>
    %cst_20 = arith.constant dense<0.000000e+00> : vector<128xf32>
    %30 = vector.multi_reduction <add>, %29, %cst_20 [0] : vector<32x128xf32> to vector<128xf32>
    %31 = vector.shape_cast %30 : vector<128xf32> to vector<1x128xf32>
    %32 = tpu.concatenate %28, %31 in 0 : vector<1x128xf32>, vector<1x128xf32> -> vector<2x128xf32>
    %c0_21 = arith.constant 0 : index
    %c0_22 = arith.constant 0 : index
    %33 = vector.load %arg9[%c0_21, %c0_22] : memref<128x128xf32, #tpu.memory_space<vmem>>, vector<128x128xf32>
    %cst_23 = arith.constant dense<0.000000e+00> : vector<2x128xf32>
    %34 = tpu.matmul %32, %33, %cst_23 {dimension_numbers = #tpu.dot_dimension_numbers<[1], [0], [0], [1], [0, 0, 1, 1], [], []>} : vector<2x128xf32>, vector<128x128xf32>, vector<2x128xf32> -> vector<2x128xf32>
    %35 = vector.extract_strided_slice %34 {offsets = [0, 0], sizes = [1, 128], strides = [1, 1]} : vector<2x128xf32> to vector<1x128xf32>
    %cst_24 = arith.constant 0.001953125 : f32
    %36 = vector.broadcast %cst_24 : f32 to vector<1x128xf32>
    %37 = arith.mulf %35, %36 : vector<1x128xf32>
    %38 = vector.extract_strided_slice %34 {offsets = [1, 0], sizes = [1, 128], strides = [1, 1]} : vector<2x128xf32> to vector<1x128xf32>
    %cst_25 = arith.constant 0.001953125 : f32
    %39 = vector.broadcast %cst_25 : f32 to vector<1x128xf32>
    %40 = arith.mulf %38, %39 : vector<1x128xf32>
    %41 = arith.mulf %37, %37 : vector<1x128xf32>
    %42 = arith.subf %40, %41 : vector<1x128xf32>
    %cst_26 = arith.constant 0.000000e+00 : f32
    %43 = vector.broadcast %cst_26 : f32 to vector<1x128xf32>
    %44 = arith.maximumf %42, %43 : vector<1x128xf32>
    %cst_27 = arith.constant 9.99999974E-6 : f32
    %45 = vector.broadcast %cst_27 : f32 to vector<1x128xf32>
    %46 = arith.addf %44, %45 : vector<1x128xf32>
    %47 = math.rsqrt %46 : vector<1x128xf32>
    %48 = arith.mulf %23, %47 : vector<1x128xf32>
    %49 = arith.mulf %37, %48 : vector<1x128xf32>
    %50 = arith.subf %24, %49 : vector<1x128xf32>
    %51 = vector.broadcast %48 : vector<1x128xf32> to vector<32x128xf32>
    %52 = arith.mulf %26, %51 : vector<32x128xf32>
    %53 = vector.broadcast %50 : vector<1x128xf32> to vector<32x128xf32>
    %54 = arith.addf %52, %53 : vector<32x128xf32>
    %55 = vector.shape_cast %54 : vector<32x128xf32> to vector<2x16x128xf32>
    %c0_28 = arith.constant 0 : index
    %c0_29 = arith.constant 0 : index
    %56 = vector.load %arg6[%c0_28, %c0_29] : memref<1x128xf32, #tpu.memory_space<vmem>>, vector<1x128xf32>
    %cst_30 = arith.constant 0.000000e+00 : f32
    %57 = vector.broadcast %cst_30 : f32 to vector<2x1x128xf32>
    %58 = vector.extract_strided_slice %55 {offsets = [0, 0, 0], sizes = [2, 15, 128], strides = [1, 1, 1]} : vector<2x16x128xf32> to vector<2x15x128xf32>
    %59 = tpu.concatenate %57, %58 in 1 : vector<2x1x128xf32>, vector<2x15x128xf32> -> vector<2x16x128xf32>
    %60 = vector.extract_strided_slice %55 {offsets = [0, 1, 0], sizes = [2, 15, 128], strides = [1, 1, 1]} : vector<2x16x128xf32> to vector<2x15x128xf32>
    %61 = tpu.concatenate %60, %57 in 1 : vector<2x15x128xf32>, vector<2x1x128xf32> -> vector<2x16x128xf32>
    %62 = vector.shape_cast %59 : vector<2x16x128xf32> to vector<32x128xf32>
    %c0_31 = arith.constant 0 : index
    %c0_32 = arith.constant 0 : index
    %c0_33 = arith.constant 0 : index
    %63 = vector.load %arg5[%c0_31, %c0_32, %c0_33] : memref<3x128x128xf32, #tpu.memory_space<vmem>>, vector<1x128x128xf32>
    %64 = vector.shape_cast %63 : vector<1x128x128xf32> to vector<128x128xf32>
    %cst_34 = arith.constant dense<0.000000e+00> : vector<32x128xf32>
    %65 = tpu.matmul %62, %64, %cst_34 {dimension_numbers = #tpu.dot_dimension_numbers<[1], [0], [0], [1], [0, 0, 1, 1], [], []>} : vector<32x128xf32>, vector<128x128xf32>, vector<32x128xf32> -> vector<32x128xf32>
    %66 = vector.shape_cast %55 : vector<2x16x128xf32> to vector<32x128xf32>
    %c1_35 = arith.constant 1 : index
    %c0_36 = arith.constant 0 : index
    %c0_37 = arith.constant 0 : index
    %67 = vector.load %arg5[%c1_35, %c0_36, %c0_37] : memref<3x128x128xf32, #tpu.memory_space<vmem>>, vector<1x128x128xf32>
    %68 = vector.shape_cast %67 : vector<1x128x128xf32> to vector<128x128xf32>
    %cst_38 = arith.constant dense<0.000000e+00> : vector<32x128xf32>
    %69 = tpu.matmul %66, %68, %cst_38 {dimension_numbers = #tpu.dot_dimension_numbers<[1], [0], [0], [1], [0, 0, 1, 1], [], []>} : vector<32x128xf32>, vector<128x128xf32>, vector<32x128xf32> -> vector<32x128xf32>
    %70 = arith.addf %65, %69 : vector<32x128xf32>
    %71 = vector.shape_cast %61 : vector<2x16x128xf32> to vector<32x128xf32>
    %c2_39 = arith.constant 2 : index
    %c0_40 = arith.constant 0 : index
    %c0_41 = arith.constant 0 : index
    %72 = vector.load %arg5[%c2_39, %c0_40, %c0_41] : memref<3x128x128xf32, #tpu.memory_space<vmem>>, vector<1x128x128xf32>
    %73 = vector.shape_cast %72 : vector<1x128x128xf32> to vector<128x128xf32>
    %cst_42 = arith.constant dense<0.000000e+00> : vector<32x128xf32>
    %74 = tpu.matmul %71, %73, %cst_42 {dimension_numbers = #tpu.dot_dimension_numbers<[1], [0], [0], [1], [0, 0, 1, 1], [], []>} : vector<32x128xf32>, vector<128x128xf32>, vector<32x128xf32> -> vector<32x128xf32>
    %75 = arith.addf %70, %74 : vector<32x128xf32>
    %76 = vector.broadcast %56 : vector<1x128xf32> to vector<32x128xf32>
    %77 = arith.addf %75, %76 : vector<32x128xf32>
    %c0_43 = arith.constant 0 : index
    %c0_44 = arith.constant 0 : index
    %78 = vector.load %arg7[%c0_43, %c0_44] : memref<1x128xf32, #tpu.memory_space<vmem>>, vector<1x128xf32>
    %c0_45 = arith.constant 0 : index
    %c0_46 = arith.constant 0 : index
    %79 = vector.load %arg8[%c0_45, %c0_46] : memref<1x128xf32, #tpu.memory_space<vmem>>, vector<1x128xf32>
    %cst_47 = arith.constant 0.000000e+00 : f32
    %80 = vector.broadcast %cst_47 : f32 to vector<32x128xf32>
    %81 = arith.maximumf %77, %80 : vector<32x128xf32>
    %cst_48 = arith.constant dense<0.000000e+00> : vector<128xf32>
    %82 = vector.multi_reduction <add>, %81, %cst_48 [0] : vector<32x128xf32> to vector<128xf32>
    %83 = vector.shape_cast %82 : vector<128xf32> to vector<1x128xf32>
    %84 = arith.mulf %81, %81 : vector<32x128xf32>
    %cst_49 = arith.constant dense<0.000000e+00> : vector<128xf32>
    %85 = vector.multi_reduction <add>, %84, %cst_49 [0] : vector<32x128xf32> to vector<128xf32>
    %86 = vector.shape_cast %85 : vector<128xf32> to vector<1x128xf32>
    %87 = tpu.concatenate %83, %86 in 0 : vector<1x128xf32>, vector<1x128xf32> -> vector<2x128xf32>
    %c0_50 = arith.constant 0 : index
    %c0_51 = arith.constant 0 : index
    %88 = vector.load %arg9[%c0_50, %c0_51] : memref<128x128xf32, #tpu.memory_space<vmem>>, vector<128x128xf32>
    %cst_52 = arith.constant dense<0.000000e+00> : vector<2x128xf32>
    %89 = tpu.matmul %87, %88, %cst_52 {dimension_numbers = #tpu.dot_dimension_numbers<[1], [0], [0], [1], [0, 0, 1, 1], [], []>} : vector<2x128xf32>, vector<128x128xf32>, vector<2x128xf32> -> vector<2x128xf32>
    %90 = vector.extract_strided_slice %89 {offsets = [0, 0], sizes = [1, 128], strides = [1, 1]} : vector<2x128xf32> to vector<1x128xf32>
    %cst_53 = arith.constant 0.001953125 : f32
    %91 = vector.broadcast %cst_53 : f32 to vector<1x128xf32>
    %92 = arith.mulf %90, %91 : vector<1x128xf32>
    %93 = vector.extract_strided_slice %89 {offsets = [1, 0], sizes = [1, 128], strides = [1, 1]} : vector<2x128xf32> to vector<1x128xf32>
    %cst_54 = arith.constant 0.001953125 : f32
    %94 = vector.broadcast %cst_54 : f32 to vector<1x128xf32>
    %95 = arith.mulf %93, %94 : vector<1x128xf32>
    %96 = arith.mulf %92, %92 : vector<1x128xf32>
    %97 = arith.subf %95, %96 : vector<1x128xf32>
    %cst_55 = arith.constant 0.000000e+00 : f32
    %98 = vector.broadcast %cst_55 : f32 to vector<1x128xf32>
    %99 = arith.maximumf %97, %98 : vector<1x128xf32>
    %cst_56 = arith.constant 9.99999974E-6 : f32
    %100 = vector.broadcast %cst_56 : f32 to vector<1x128xf32>
    %101 = arith.addf %99, %100 : vector<1x128xf32>
    %102 = math.rsqrt %101 : vector<1x128xf32>
    %103 = arith.mulf %78, %102 : vector<1x128xf32>
    %104 = arith.mulf %92, %103 : vector<1x128xf32>
    %105 = arith.subf %79, %104 : vector<1x128xf32>
    %106 = vector.broadcast %103 : vector<1x128xf32> to vector<32x128xf32>
    %107 = arith.mulf %81, %106 : vector<32x128xf32>
    %108 = vector.broadcast %105 : vector<1x128xf32> to vector<32x128xf32>
    %109 = arith.addf %107, %108 : vector<32x128xf32>
    %c0_57 = arith.constant 0 : index
    %c0_58 = arith.constant 0 : index
    %110 = vector.load %arg10[%c0_57, %c0_58] : memref<32x128xf32, #tpu.memory_space<vmem>>, vector<32x128xf32>
    tpu.vector_store %arg10[%c0_57, %c0_58], %109 {strides = array<i32>} : memref<32x128xf32, #tpu.memory_space<vmem>>, vector<32x128xf32>,
    return
  }
}

</mosaic_0001>

<bundles_post_ra>
// kernel: tile.33
= control target key start
LH: loop header
LB: loop body
LE: loop exit
PB: predicated region body
PF: predicated region fallthrough
CT: control target
= control target key end

     0   :  { %s28_s0 = inlined_call_operand.vmem [shape: f32[8], index: 0, kind: input, shape index: {}]   ;;  %s29_s1 = inlined_call_operand.vmem [shape: f32[16,8], index: 1, kind: output, shape index: {}]  }
   0x1   :  { %v4_v0 = vld [vmem:[%s28_s0] ss:$0 sm:$0xff] }
   0x2   :  { %5 = vst [vmem:[%s29_s1] sm:$0xff] %v4_v0  ;;  %8 = vst [vmem:[%s29_s1 + $0x8] sm:$0xff] %v4_v0 }

// kernel: tile.34
= control target key start
LH: loop header
LB: loop body
LE: loop exit
PB: predicated region body
PF: predicated region fallthrough
CT: control target
= control target key end

     0   :  { %s131_s10 = smov 120   ;;  %s132_s11 = smov 104   ;;  %vm3_vm0 = vcmask 64512   ;;  %vm9_vm1 = vcmask 1048512   ;;  %vm15_vm2 = vcmask 982912   ;;  %vm21_vm3 = vcmask 917312   ;;  %s207_s0 = inlined_call_operand.vmem [shape: f32[16,8], index: 0, kind: input, shape index: {}]   ;;  %s208_s1 = inlined_call_operand.vmem [shape: f32[1,128], index: 1, kind: output, shape index: {}]  }
   0x1   :  { %v101_v0 = vld [vmem:[%s207_s0 + $0xf] sm:$0x1]   ;;  %v103_v1 = vld [vmem:[%s207_s0 + $0xd] sm:$0x1]   ;;  %v102_v2 = vld [vmem:[%s207_s0 + $0xe] sm:$0x1]  }
   0x2   :  { %7 = vrot.lane.b32.xlu0 %v101_v0, %s131_s10  ;;  %19 = vrot.lane.b32.xlu1 %v103_v1, %s132_s11  ;;  %v104_v3 = vld [vmem:[%s207_s0 + $0xc] sm:$0x1]   ;;  %s133_s16 = smov 112   ;;  %s134_s17 = smov 96   ;;  %v105_v4 = vld [vmem:[%s207_s0 + $0xb] sm:$0x1]  }
   0x3   :  { %v106_v5 = vld [vmem:[%s207_s0 + $0xa] sm:$0x1]   ;;  %v2_v6 = vld [vmem:[%s207_s0] sm:$0x1]   ;;  %s135_s24 = smov 88   ;;  %s136_s25 = smov 80  }
   0x4   :  { %4 = vst.msk [vmem:[#allocation0] sm:$0x1] %vm3_vm0, %v2_v6   ;;  %v107_v7 = vld [vmem:[%s207_s0 + $0x9] sm:$0x1]   ;;  %v108_v8 = vld [vmem:[%s207_s0 + $0x8] sm:$0x1]  }
   0x5   :  { %s137_s30 = smov 72   ;;  %s138_s2 = smov 64   ;;  %v109_v9 = vld [vmem:[%s207_s0 + $0x7] sm:$0x1]   ;;  %v110_v10 = vld [vmem:[%s207_s0 + $0x6] sm:$0x1]  }
   0x6   :  { %13 = vrot.lane.b32.xlu0 %v102_v2, %s133_s16  ;;  %25 = vrot.lane.b32.xlu1 %v104_v3, %s134_s17  ;;  %s139_s7 = smov 56   ;;  %s140_s8 = smov 48   ;;  %v111_v11 = vld [vmem:[%s207_s0 + $0x5] sm:$0x1]   ;;  %v112_v12 = vld [vmem:[%s207_s0 + $0x4] sm:$0x1]  }
   0x7   :  { %s141_s13 = smov 40   ;;  %s142_s14 = smov 32   ;;  %v113_v13 = vld [vmem:[%s207_s0 + $0x3] sm:$0x1]   ;;  %v114_v14 = vld [vmem:[%s207_s0 + $0x2] sm:$0x1]  }
   0x8   :  { %s143_s19 = smov 24   ;;  %s144_s20 = smov 16   ;;  %v115_v15 = vld [vmem:[%s207_s0 + $0x1] sm:$0x1]   ;;  %vm27_vm4 = vcmask 851712   ;;  %vm33_vm5 = vcmask 786112  }
   0x9   :  { %s145_s0 = smov 8   ;;  %vm39_vm6 = vcmask 720512   ;;  %vm45_vm7 = vcmask 654912   ;;  %vm51_vm8 = vcmask 589312   ;;  %vm57_vm9 = vcmask 523712  }
   0xa   :  { %31 = vrot.lane.b32.xlu0 %v105_v4, %s135_s24  ;;  %37 = vrot.lane.b32.xlu1 %v106_v5, %s136_s25  ;;  %vm63_vm10 = vcmask 458112   ;;  %vm69_vm11 = vcmask 392512   ;;  %vm75_vm12 = vcmask 326912   ;;  %vm81_vm13 = vcmask 261312  }
   0xb   :  { %vm87_vm14 = vcmask 195712   ;;  %vm93_vm15 = vcmask 130112  }
   0xe   :  { %43 = vrot.lane.b32.xlu0 %v107_v7, %s137_s30  ;;  %49 = vrot.lane.b32.xlu1 %v108_v8, %s138_s2 }
  0x12   :  { %55 = vrot.lane.b32.xlu0 %v109_v9, %s139_s7  ;;  %61 = vrot.lane.b32.xlu1 %v110_v10, %s140_s8 }
  0x16   :  { %67 = vrot.lane.b32.xlu0 %v111_v11, %s141_s13  ;;  %73 = vrot.lane.b32.xlu1 %v112_v12, %s142_s14 }
  0x1a   :  { %79 = vrot.lane.b32.xlu0 %v113_v13, %s143_s19  ;;  %85 = vrot.lane.b32.xlu1 %v114_v14, %s144_s20 }
  0x1e   :  { %91 = vrot.lane.b32.xlu0 %v115_v15, %s145_s0 }
  0x74   :  { %v8_v16 = vpop.permute.xlu0 %7   ;;  %v20_v17 = vpop.permute.xlu1 %19  }
  0x75   :  { %10 = vst.msk [vmem:[#allocation0] sm:$0x1] %vm9_vm1, %v8_v16  }
  0x78   :  { %v14_v18 = vpop.permute.xlu0 %13   ;;  %v26_v19 = vpop.permute.xlu1 %25  }
  0x79   :  { %16 = vst.msk [vmem:[#allocation0] sm:$0x1] %vm15_vm2, %v14_v18  }
  0x7a   :  { %22 = vst.msk [vmem:[#allocation0] sm:$0x1] %vm21_vm3, %v20_v17  }
  0x7b   :  { %28 = vst.msk [vmem:[#allocation0] sm:$0x1] %vm27_vm4, %v26_v19  }
  0x7c   :  { %v32_v20 = vpop.permute.xlu0 %31   ;;  %v38_v21 = vpop.permute.xlu1 %37  }
  0x7d   :  { %34 = vst.msk [vmem:[#allocation0] sm:$0x1] %vm33_vm5, %v32_v20  }
  0x7e   :  { %40 = vst.msk [vmem:[#allocation0] sm:$0x1] %vm39_vm6, %v38_v21  }
  0x80   :  { %v44_v22 = vpop.permute.xlu0 %43   ;;  %v50_v23 = vpop.permute.xlu1 %49  }
  0x81   :  { %46 = vst.msk [vmem:[#allocation0] sm:$0x1] %vm45_vm7, %v44_v22  }
  0x82   :  { %52 = vst.msk [vmem:[#allocation0] sm:$0x1] %vm51_vm8, %v50_v23  }
  0x84   :  { %v56_v24 = vpop.permute.xlu0 %55   ;;  %v62_v25 = vpop.permute.xlu1 %61  }
  0x85   :  { %58 = vst.msk [vmem:[#allocation0] sm:$0x1] %vm57_vm9, %v56_v24  }
  0x86   :  { %64 = vst.msk [vmem:[#allocation0] sm:$0x1] %vm63_vm10, %v62_v25  }
  0x88   :  { %v68_v26 = vpop.permute.xlu0 %67   ;;  %v74_v27 = vpop.permute.xlu1 %73  }
  0x89   :  { %70 = vst.msk [vmem:[#allocation0] sm:$0x1] %vm69_vm11, %v68_v26  }
  0x8a   :  { %76 = vst.msk [vmem:[#allocation0] sm:$0x1] %vm75_vm12, %v74_v27  }
  0x8c   :  { %v80_v28 = vpop.permute.xlu0 %79   ;;  %v86_v29 = vpop.permute.xlu1 %85  }
  0x8d   :  { %82 = vst.msk [vmem:[#allocation0] sm:$0x1] %vm81_vm13, %v80_v28  }
  0x8e   :  { %88 = vst.msk [vmem:[#allocation0] sm:$0x1] %vm87_vm14, %v86_v29  }
  0x90   :  { %v92_v30 = vpop.permute.xlu0 %91  }
  0x91   :  { %94 = vst.msk [vmem:[#allocation0] sm:$0x1] %vm93_vm15, %v92_v30  }
  0x98   :  { %v98_v31 = vld [vmem:[#allocation0] sm:$0x1] }
  0x99   :  { %100 = vst [vmem:[%s208_s1] sm:$0x1] %v98_v31 }

// kernel: unet_block_forward.1
= control target key start
LH: loop header
LB: loop body
LE: loop exit
PB: predicated region body
PF: predicated region fallthrough
CT: control target
= control target key end

     0   :  { %vm83_vm0 = vcmask 523264   ;;  %vm44_vm1 = vcmask 1040384   ;;  %vm55_vm2 = vcmask 1046528   ;;  %v1722_v58 = vmov 0.0|0.0   ;;  %s2237_s1 = inlined_call_operand.vmem [shape: f32[3,64,128], index: 1, kind: input, shape index: {}]   ;;  %s2238_s0 = inlined_call_operand.vmem [shape: f32[2,16,64], index: 0, kind: input, shape index: {}]   ;;  %s2239_s9 = inlined_call_operand.vmem [shape: f32[128,128], index: 9, kind: input, shape index: {}]   ;;  %s2240_s2 = inlined_call_operand.vmem [shape: f32[1,128], index: 2, kind: input, shape index: {}]   ;;  %s2241_s5 = inlined_call_operand.vmem [shape: f32[3,128,128], index: 5, kind: input, shape index: {}]   ;;  %s2242_s3 = inlined_call_operand.vmem [shape: f32[1,128], index: 3, kind: input, shape index: {}]   ;;  %s2243_s4 = inlined_call_operand.vmem [shape: f32[1,128], index: 4, kind: input, shape index: {}]   ;;  %s2244_s6 = inlined_call_operand.vmem [shape: f32[1,128], index: 6, kind: input, shape index: {}]   ;;  %s2245_s7 = inlined_call_operand.vmem [shape: f32[1,128], index: 7, kind: input, shape index: {}]   ;;  %s2246_s8 = inlined_call_operand.vmem [shape: f32[1,128], index: 8, kind: input, shape index: {}]   ;;  %s2247_s10 = inlined_call_operand.vmem [shape: f32[32,128], index: 10, kind: output, shape index: {}]  }
   0x1   :  { %v1058_v0 = vld [vmem:[%s2237_s1 + $0x40] sm:$0xff]  ;;  %v1059_v1 = vld [vmem:[%s2237_s1 + $0x48] sm:$0xff]  ;;  %v1060_v2 = vld [vmem:[%s2237_s1 + $0x50] sm:$0xff]  ;;  %vm1723_vm3 = vmmov 0  }
   0x2   :  { %v1506_v3 = vpack.c.bf16 %v1059_v1, %v1058_v0  ;;  %v1061_v4 = vld [vmem:[%s2237_s1 + $0x58] sm:$0xff]  ;;  %v1062_v6 = vld [vmem:[%s2237_s1 + $0x60] sm:$0xff]  ;;  %v1063_v7 = vld [vmem:[%s2237_s1 + $0x68] sm:$0xff] }
   0x3   :  { %v1510_v5 = vpack.c.bf16 %v1061_v4, %v1060_v2  ;;  %v1802_v8 = vld [vmem:[%s2238_s0] sm:$0xff]  ;;  %v1514_v9 = vpack.c.bf16 %v1063_v7, %v1062_v6  ;;  %v1064_v10 = vld [vmem:[%s2237_s1 + $0x70] sm:$0xff]  ;;  %v1065_v11 = vld [vmem:[%s2237_s1 + $0x78] sm:$0xff] }
   0x4   :  { %1507 = vmatprep.subr.bf16.mxu0 %v1506_v3  ;;  %1272 = vmatprep.mubr.msk.f32.mxu0 %vm83_vm0, %v1802_v8  ;;  %v1518_v12 = vpack.c.bf16 %v1065_v11, %v1064_v10  ;;  %v66_v13 = vld [vmem:[%s2237_s1] sm:$0xff]  ;;  %v67_v14 = vld [vmem:[%s2237_s1 + $0x8] sm:$0xff]  ;;  %v68_v16 = vld [vmem:[%s2237_s1 + $0x10] sm:$0xff]  ;;  %v45_v19 = vrot.slane %v1802_v8, 7  ;;  %v56_v39 = vrot.slane %v1802_v8, 1 }
   0x5   :  { %1509 = vmatpush3.bf16.msra.mxu0 %v1506_v3  ;;  %v1522_v15 = vpack.c.bf16 %v67_v14, %v66_v13  ;;  %v69_v17 = vld [vmem:[%s2237_s1 + $0x18] sm:$0xff]  ;;  %v1827_v18 = vld [vmem:[%s2238_s0 + $0x8] sm:$0xff]  ;;  %v1833_v21 = vld [vmem:[%s2238_s0 + $0x10] sm:$0xff] }
   0x6   :  { %1511 = vmatprep.subr.bf16.mxu0 %v1510_v5  ;;  %v1526_v20 = vpack.c.bf16 %v69_v17, %v68_v16  ;;  %v70_v22 = vld [vmem:[%s2237_s1 + $0x20] sm:$0xff]  ;;  %v71_v23 = vld [vmem:[%s2237_s1 + $0x28] sm:$0xff]  ;;  %v38_v24 = vld [vmem:[%s2238_s0 + $0x18] sm:$0xff]  ;;  %v53_v26 = vsel %vm44_vm1, 0.0, %v45_v19  ;;  %v46_v32 = vrot.slane %v1827_v18, 7  ;;  %v48_v34 = vrot.slane %v1833_v21, 7 }
   0x7   :  { %v1530_v25 = vpack.c.bf16 %v71_v23, %v70_v22  ;;  %v72_v27 = vld [vmem:[%s2237_s1 + $0x30] sm:$0xff]  ;;  %v73_v28 = vld [vmem:[%s2237_s1 + $0x38] sm:$0xff]  ;;  %v1074_v30 = vld [vmem:[%s2237_s1 + $0x80] sm:$0xff]  ;;  %v49_v37 = vrot.slane %v38_v24, 7  ;;  %v57_v40 = vrot.slane %v1827_v18, 1  ;;  %v59_v51 = vrot.slane %v1833_v21, 1 }
   0x8   :  { %v1534_v29 = vpack.c.bf16 %v73_v28, %v72_v27  ;;  %v1075_v31 = vld [vmem:[%s2237_s1 + $0x88] sm:$0xff]  ;;  %v1076_v35 = vld [vmem:[%s2237_s1 + $0x90] sm:$0xff]  ;;  %v1077_v36 = vld [vmem:[%s2237_s1 + $0x98] sm:$0xff]  ;;  %v47_v38 = vsel %vm44_vm1, %v45_v19, %v46_v32  ;;  %v54_v42 = vsel %vm44_vm1, 0.0, %v48_v34  ;;  %v60_v52 = vrot.slane %v38_v24, 1 }
   0x9   :  { %1513 = vmatpush3.bf16.msra.mxu0 %v1510_v5  ;;  %v1538_v33 = vpack.c.bf16 %v1075_v31, %v1074_v30  ;;  %v1542_v41 = vpack.c.bf16 %v1077_v36, %v1076_v35  ;;  %v1078_v43 = vld [vmem:[%s2237_s1 + $0xa0] sm:$0xff]  ;;  %v1079_v44 = vld [vmem:[%s2237_s1 + $0xa8] sm:$0xff]  ;;  %v50_v45 = vsel %vm44_vm1, %v48_v34, %v49_v37  ;;  %v58_v47 = vsel %vm55_vm2, %v56_v39, %v57_v40  ;;  %v1080_v48 = vld [vmem:[%s2237_s1 + $0xb0] sm:$0xff] }
   0xa   :  { %1515 = vmatprep.subr.bf16.mxu0 %v1514_v9  ;;  %v1546_v46 = vpack.c.bf16 %v1079_v44, %v1078_v43  ;;  %v1081_v49 = vld [vmem:[%s2237_s1 + $0xb8] sm:$0xff]  ;;  %v419_v53 = vld [vmem:[%s2239_s9] sm:$0xff]  ;;  %v420_v54 = vld [vmem:[%s2239_s9 + $0x8] sm:$0xff]  ;;  %v64_v55 = vsel %vm55_vm2, %v57_v40, 0.0  ;;  %v61_v57 = vsel %vm55_vm2, %v59_v51, %v60_v52  ;;  %v65_v59 = vsel %vm55_vm2, %v60_v52, 0.0 }
   0xb   :  { %v1550_v50 = vpack.c.bf16 %v1081_v49, %v1080_v48  ;;  %v1901_v56 = vpack.c.bf16 %v420_v54, %v419_v53  ;;  %v421_v60 = vld [vmem:[%s2239_s9 + $0x10] sm:$0xff]  ;;  %v422_v61 = vld [vmem:[%s2239_s9 + $0x18] sm:$0xff]  ;;  %v423_v63 = vld [vmem:[%s2239_s9 + $0x20] sm:$0xff]  ;;  %v1724_v16 = vmov 0.0  }
   0xc   :  { %v1917_v62 = vpack.c.bf16 %v422_v61, %v421_v60  ;;  %v424_v0 = vld [vmem:[%s2239_s9 + $0x28] sm:$0xff]  ;;  %v425_v2 = vld [vmem:[%s2239_s9 + $0x30] sm:$0xff]  ;;  %v426_v3 = vld [vmem:[%s2239_s9 + $0x38] sm:$0xff] }
   0xd   :  { %1517 = vmatpush3.bf16.msra.mxu0 %v1514_v9  ;;  %v1927_v1 = vpack.c.bf16 %v424_v0, %v423_v63  ;;  %v1937_v4 = vpack.c.bf16 %v426_v3, %v425_v2  ;;  %v427_v5 = vld [vmem:[%s2239_s9 + $0x40] sm:$0xff]  ;;  %v428_v6 = vld [vmem:[%s2239_s9 + $0x48] sm:$0xff]  ;;  %v429_v8 = vld [vmem:[%s2239_s9 + $0x50] sm:$0xff] }
   0xe   :  { %1519 = vmatprep.subr.bf16.mxu0 %v1518_v12  ;;  %v1947_v7 = vpack.c.bf16 %v428_v6, %v427_v5  ;;  %v430_v9 = vld [vmem:[%s2239_s9 + $0x58] sm:$0xff]  ;;  %v431_v11 = vld [vmem:[%s2239_s9 + $0x60] sm:$0xff]  ;;  %v433_v14 = vld [vmem:[%s2239_s9 + $0x70] sm:$0xff] }
   0xf   :  { %v1957_v10 = vpack.c.bf16 %v430_v9, %v429_v8  ;;  %v1087_v54 = vld [vmem:[%s2241_s5 + $0x80] sm:$0xff]  ;;  %v1092_v61 = vld [vmem:[%s2241_s5 + $0xa8] sm:$0xff]  ;;  %v1093_v63 = vld [vmem:[%s2241_s5 + $0xb0] sm:$0xff] }
  0x10   :  { %v1091_v60 = vld [vmem:[%s2241_s5 + $0xa0] sm:$0xff]  ;;  %v1094_v0 = vld [vmem:[%s2241_s5 + $0xb8] sm:$0xff]  ;;  %v1096_v3 = vld [vmem:[%s2241_s5 + $0xc8] sm:$0xff] }
  0x11   :  { %1521 = vmatpush3.bf16.msra.mxu0 %v1518_v12  ;;  %v432_v12 = vld [vmem:[%s2239_s9 + $0x68] sm:$0xff]  ;;  %v1095_v2 = vld [vmem:[%s2241_s5 + $0xc0] sm:$0xff]  ;;  %v1097_v5 = vld [vmem:[%s2241_s5 + $0xd0] sm:$0xff] }
  0x12   :  { %1523 = vmatprep.subr.bf16.mxu0 %v1522_v15  ;;  %v1573_v13 = vpack.c.bf16 %v432_v12, %v431_v11  ;;  %v1098_v6 = vld [vmem:[%s2241_s5 + $0xd8] sm:$0xff]  ;;  %v1099_v8 = vld [vmem:[%s2241_s5 + $0xe0] sm:$0xff]  ;;  %v1100_v9 = vld [vmem:[%s2241_s5 + $0xe8] sm:$0xff] }
  0x13   :  { %v1101_v11 = vld [vmem:[%s2241_s5 + $0xf0] sm:$0xff]  ;;  %v1102_v12 = vld [vmem:[%s2241_s5 + $0xf8] sm:$0xff]  ;;  %vm2110_vm4 = vmneg %vm44_vm1 }
  0x14   :  { %1273 = vmatmul.mubr.msk.f32.vlgmr.msra.gmra.mrb[0].mxu0 %vm83_vm0, %v1827_v18  ;;  %v1086_v18 = vld [vmem:[%s2240_s2] ss:$0 sm:$0xff] }
  0x15   :  { %1525 = vmatpush3.bf16.msra.mxu0 %v1522_v15  ;;  %1275 = vmatprep.mubr.msk.f32.mxu0 %vm83_vm0, %v1833_v21  ;;  %v434_v15 = vld [vmem:[%s2239_s9 + $0x78] sm:$0xff] }
  0x16   :  { %1527 = vmatprep.subr.bf16.mxu0 %v1526_v20  ;;  %v1576_v17 = vpack.c.bf16 %v434_v15, %v433_v14  ;;  %v583_v14 = vld [vmem:[%s2241_s5] sm:$0xff]  ;;  %v584_v15 = vld [vmem:[%s2241_s5 + $0x8] sm:$0xff] }
  0x18   :  { %1276 = vmatmul.mubr.msk.f32.gmra.mrb[2].mxu0 %vm83_vm0, %v38_v24 }
  0x19   :  { %1529 = vmatpush3.bf16.msra.mxu0 %v1526_v20  ;;  %1294 = vmatprep.mubr.msk.f32.mxu0 %vm83_vm0, %v53_v26 }
  0x1a   :  { %1531 = vmatprep.subr.bf16.mxu0 %v1530_v25 }
  0x1d   :  { %1533 = vmatpush3.bf16.msra.mxu0 %v1530_v25 }
  0x1e   :  { %1535 = vmatprep.subr.bf16.mxu0 %v1534_v29 }
  0x21   :  { %1537 = vmatpush3.bf16.msra.mxu0 %v1534_v29 }
  0x22   :  { %1539 = vmatprep.subr.bf16.mxu0 %v1538_v33 }
  0x24   :  { %1295 = vmatmul.mubr.msk.f32.vlgmr.msra.gmra.mrb[0].mxu0 %vm83_vm0, %v47_v38 }
  0x25   :  { %1541 = vmatpush3.bf16.msra.mxu0 %v1538_v33  ;;  %1297 = vmatprep.mubr.msk.f32.mxu0 %vm83_vm0, %v54_v42 }
  0x26   :  { %1543 = vmatprep.subr.bf16.mxu0 %v1542_v41 }
  0x28   :  { %1298 = vmatmul.mubr.msk.f32.gmra.mrb[2].mxu0 %vm83_vm0, %v50_v45 }
  0x29   :  { %1545 = vmatpush3.bf16.msra.mxu0 %v1542_v41  ;;  %1316 = vmatprep.mubr.msk.f32.mxu0 %vm83_vm0, %v58_v47 }
  0x2a   :  { %1547 = vmatprep.subr.bf16.mxu0 %v1546_v46 }
  0x2d   :  { %1549 = vmatpush3.bf16.msra.mxu0 %v1546_v46 }
  0x2e   :  { %1551 = vmatprep.subr.bf16.mxu0 %v1550_v50 }
  0x31   :  { %1553 = vmatpush3.bf16.msra.mxu0 %v1550_v50 }
  0x32   :  { %1554 = vmatprep.subr.bf16.mxu0 %v1722_v58 }
  0x34   :  { %1317 = vmatmul.mubr.msk.f32.vlgmr.msra.gmra.mrb[0].mxu0 %vm83_vm0, %v64_v55  ;;  %v1088_v55 = vld [vmem:[%s2241_s5 + $0x88] sm:$0xff] }
  0x35   :  { %1319 = vmatprep.mubr.msk.f32.mxu0 %vm83_vm0, %v61_v57  ;;  %1556 = vmatpush3.bf16.msra.mxu0 %v1901_v56  ;;  %v1089_v57 = vld [vmem:[%s2241_s5 + $0x90] sm:$0xff] }
  0x36   :  { %1557 = vmatprep.subr.bf16.mxu0 %v1722_v58 }
  0x38   :  { %1320 = vmatmul.mubr.msk.f32.gmra.mrb[2].mxu0 %vm83_vm0, %v65_v59 }
  0x39   :  { %1559 = vmatpush3.bf16.msra.mxu0 %v1917_v62  ;;  %1354 = vmatprep.mubr.msk.f32.mxu0 %vm1723_vm3, %v1724_v16 }
  0x3a   :  { %1560 = vmatprep.subr.bf16.mxu0 %v1722_v58 }
  0x3d   :  { %1562 = vmatpush3.bf16.msra.mxu0 %v1927_v1 }
  0x3e   :  { %1563 = vmatprep.subr.bf16.mxu0 %v1722_v58 }
  0x41   :  { %1565 = vmatpush3.bf16.msra.mxu0 %v1937_v4 }
  0x42   :  { %1566 = vmatprep.subr.bf16.mxu0 %v1722_v58 }
  0x45   :  { %1568 = vmatpush3.bf16.msra.mxu0 %v1947_v7 }
  0x46   :  { %1569 = vmatprep.subr.bf16.mxu0 %v1722_v58 }
  0x49   :  { %1571 = vmatpush3.bf16.msra.mxu0 %v1957_v10 }
  0x4a   :  { %1572 = vmatprep.subr.bf16.mxu0 %v1722_v58 }
  0x4d   :  { %1574 = vmatpush3.bf16.msra.mxu0 %v1573_v13 }
  0x4e   :  { %1575 = vmatprep.subr.bf16.mxu0 %v1722_v58 }
  0x51   :  { %1577 = vmatpush3.bf16.msra.mxu0 %v1576_v17 }
  0x52   :  { %1674 = vmatprep.subr.bf16.mxu0 %v1722_v58 }
 0x107   :  { %v1318_v19 = vpop.f32.mrb[0].mxu0 }
 0x108   :  { %v387_v20 = vadd.f32 %v1318_v19, %v1086_v18  ;;  %v357_v21 = vpop.f32.mrb[1].mxu0 }
 0x109   :  { %v386_v22 = vadd.f32 %v1086_v18, %v357_v21 }
 0x10a   :  { %v1979_v23 = vmax.f32 %v387_v20, 0.0 }
 0x10b   :  { %v1981_v24 = vmax.f32 %v386_v22, 0.0  ;;  %v1321_v25 = vpop.f32.mrb[2].mxu0 }
 0x10c   :  { %v389_v26 = vadd.f32 %v1321_v25, %v1086_v18  ;;  %v367_v27 = vpop.f32.mrb[3].mxu0  ;;  %v406_v28 = vmul.f32 %v1979_v23, %v1979_v23 }
 0x10d   :  { %v405_v29 = vmul.f32 %v1981_v24, %v1981_v24  ;;  %v388_v30 = vadd.f32 %v1086_v18, %v367_v27  ;;  %v396_v31 = vadd.f32 %v1979_v23, %v1981_v24  ;;  %v1725_v27 = vmov 1966171168  }
 0x10e   :  { %v1989_v32 = vmax.f32 %v389_v26, 0.0 }
 0x10f   :  { %v1991_v33 = vmax.f32 %v388_v30, 0.0  ;;  %v409_v34 = vadd.f32 %v406_v28, %v405_v29  ;;  %v516_v28 = vunpack.c.l.s4 %v1725_v27  ;;  %v518_v29 = vlaneseq }
 0x110   :  { %v408_v37 = vmul.f32 %v1989_v32, %v1989_v32 }
 0x111   :  { %v397_v35 = vadd.f32 %v396_v31, %v1991_v33  ;;  %v407_v36 = vmul.f32 %v1991_v33, %v1991_v33  ;;  %v517_v30 = vunpack.c.0.s8 %v516_v28  ;;  %v519_v31 = vshrl.u32 %v518_v29, 7  ;;  %v1113_v28 = vld [vmem:[%s2241_s5 + $0x130] sm:$0xff]  ;;  %v1114_v29 = vld [vmem:[%s2241_s5 + $0x138] sm:$0xff] }
 0x113   :  { %v398_v38 = vadd.f32 %v397_v35, %v1989_v32  ;;  %v410_v39 = vadd.f32 %v409_v34, %v407_v36  ;;  %v2068_v34 = vsub.s32 %v517_v30, %v519_v31 }
 0x115   :  { %v399_v40 = vrot.slane %v398_v38, 4  ;;  %v411_v41 = vadd.f32 %v410_v39, %v408_v37 }
 0x117   :  { %v400_v42 = vadd.f32 %v399_v40, %v398_v38  ;;  %v412_v43 = vrot.slane %v411_v41, 4  ;;  %v390_v38 = vld [vmem:[%s2242_s3] sm:$0x1]  ;;  %v2075_v40 = vsub.s32 0, %v519_v31  ;;  %v1654_v31 = vpack.c.bf16 %v1114_v29, %v1113_v28 }
 0x119   :  { %v401_v44 = vrot.slane %v400_v42, 2  ;;  %v413_v45 = vadd.f32 %v412_v43, %v411_v41 }
 0x11b   :  { %v402_v46 = vadd.f32 %v401_v44, %v400_v42  ;;  %v414_v47 = vrot.slane %v413_v45, 2  ;;  %v391_v42 = vld [vmem:[%s2243_s4] sm:$0x1] }
 0x11d   :  { %v403_v48 = vrot.slane %v402_v46, 1  ;;  %v415_v49 = vadd.f32 %v414_v47, %v413_v45 }
 0x11f   :  { %v416_v50 = vrot.slane %v415_v49, 1  ;;  %v404_v51 = vadd.f32 %v403_v48, %v402_v46 }
 0x121   :  { %v417_v52 = vadd.f32 %v416_v50, %v415_v49  ;;  %v585_v49 = vld [vmem:[%s2241_s5 + $0x10] sm:$0xff]  ;;  %v586_v50 = vld [vmem:[%s2241_s5 + $0x18] sm:$0xff] }
 0x123   :  { %v418_v53 = vsel %vm44_vm1, %v404_v51, %v417_v52 }
 0x124   :  { %1355 = vmatmul.mubr.f32.vlgmr.msra.gmra.mrb[4].mxu0 %v418_v53 }
 0x125   :  { %1676 = vmatpush3.bf16.msra.mxu0 %v1901_v56  ;;  %1503 = vmatprep.mubr.msk.f32.mxu0 %vm1723_vm3, %v1724_v16  ;;  %v1578_v56 = vpack.c.bf16 %v1088_v55, %v1087_v54  ;;  %v1610_v16 = vpack.c.bf16 %v584_v15, %v583_v14  ;;  %v1614_v54 = vpack.c.bf16 %v586_v50, %v585_v49  ;;  %v588_v55 = vld [vmem:[%s2241_s5 + $0x28] sm:$0xff]  ;;  %v1109_v14 = vld [vmem:[%s2241_s5 + $0x110] sm:$0xff]  ;;  %v1110_v15 = vld [vmem:[%s2241_s5 + $0x118] sm:$0xff] }
 0x126   :  { %1677 = vmatprep.subr.bf16.mxu0 %v1722_v58 }
 0x127   :  { %1579 = vmatprep.subr.bf16.mxu1 %v1578_v56 }
 0x128   :  { %1581 = vmatpush3.bf16.msra.mxu1 %v1578_v56 }
 0x129   :  { %1679 = vmatpush3.bf16.msra.mxu0 %v1917_v62  ;;  %v1586_v62 = vpack.c.bf16 %v1092_v61, %v1091_v60  ;;  %v589_v60 = vld [vmem:[%s2241_s5 + $0x30] sm:$0xff] }
 0x12a   :  { %1680 = vmatprep.subr.bf16.mxu0 %v1722_v58 }
 0x12d   :  { %1682 = vmatpush3.bf16.msra.mxu0 %v1927_v1  ;;  %v1590_v1 = vpack.c.bf16 %v1094_v0, %v1093_v63  ;;  %v592_v63 = vld [vmem:[%s2241_s5 + $0x48] sm:$0xff] }
 0x12e   :  { %1683 = vmatprep.subr.bf16.mxu0 %v1722_v58 }
 0x131   :  { %1685 = vmatpush3.bf16.msra.mxu0 %v1937_v4  ;;  %v1594_v4 = vpack.c.bf16 %v1096_v3, %v1095_v2  ;;  %v594_v2 = vld [vmem:[%s2241_s5 + $0x58] sm:$0xff] }
 0x132   :  { %1686 = vmatprep.subr.bf16.mxu0 %v1722_v58 }
 0x135   :  { %1688 = vmatpush3.bf16.msra.mxu0 %v1947_v7  ;;  %v1598_v7 = vpack.c.bf16 %v1098_v6, %v1097_v5  ;;  %v596_v5 = vld [vmem:[%s2241_s5 + $0x68] sm:$0xff] }
 0x136   :  { %1689 = vmatprep.subr.bf16.mxu0 %v1722_v58 }
 0x139   :  { %1691 = vmatpush3.bf16.msra.mxu0 %v1957_v10  ;;  %v1602_v10 = vpack.c.bf16 %v1100_v9, %v1099_v8  ;;  %v598_v8 = vld [vmem:[%s2241_s5 + $0x78] sm:$0xff] }
 0x13a   :  { %1692 = vmatprep.subr.bf16.mxu0 %v1722_v58 }
 0x13d   :  { %1694 = vmatpush3.bf16.msra.mxu0 %v1573_v13  ;;  %v1606_v13 = vpack.c.bf16 %v1102_v12, %v1101_v11  ;;  %v1108_v11 = vld [vmem:[%s2241_s5 + $0x108] sm:$0xff] }
 0x13e   :  { %1695 = vmatprep.subr.bf16.mxu0 %v1722_v58  ;;  %v1090_v58 = vld [vmem:[%s2241_s5 + $0x98] sm:$0xff] }
 0x13f   :  { %v1582_v59 = vpack.c.bf16 %v1090_v58, %v1089_v57 }
 0x141   :  { %1697 = vmatpush3.bf16.msra.mxu0 %v1576_v17  ;;  %1583 = vmatprep.subr.bf16.mxu1 %v1582_v59 }
 0x142   :  { %1585 = vmatpush3.bf16.msra.mxu1 %v1582_v59 }
 0x143   :  { %1587 = vmatprep.subr.bf16.mxu1 %v1586_v62 }
 0x146   :  { %1589 = vmatpush3.bf16.msra.mxu1 %v1586_v62  ;;  %v591_v62 = vld [vmem:[%s2241_s5 + $0x40] sm:$0xff] }
 0x147   :  { %1591 = vmatprep.subr.bf16.mxu1 %v1590_v1  ;;  %v1626_v0 = vpack.c.bf16 %v592_v63, %v591_v62 }
 0x14a   :  { %1593 = vmatpush3.bf16.msra.mxu1 %v1590_v1  ;;  %v593_v1 = vld [vmem:[%s2241_s5 + $0x50] sm:$0xff] }
 0x14b   :  { %1595 = vmatprep.subr.bf16.mxu1 %v1594_v4  ;;  %v1630_v3 = vpack.c.bf16 %v594_v2, %v593_v1 }
 0x14e   :  { %1597 = vmatpush3.bf16.msra.mxu1 %v1594_v4  ;;  %v595_v4 = vld [vmem:[%s2241_s5 + $0x60] sm:$0xff] }
 0x14f   :  { %1599 = vmatprep.subr.bf16.mxu1 %v1598_v7  ;;  %v1634_v6 = vpack.c.bf16 %v596_v5, %v595_v4 }
 0x152   :  { %1601 = vmatpush3.bf16.msra.mxu1 %v1598_v7  ;;  %v597_v7 = vld [vmem:[%s2241_s5 + $0x70] sm:$0xff] }
 0x153   :  { %1603 = vmatprep.subr.bf16.mxu1 %v1602_v10  ;;  %v1638_v9 = vpack.c.bf16 %v598_v8, %v597_v7 }
 0x156   :  { %1605 = vmatpush3.bf16.msra.mxu1 %v1602_v10  ;;  %v1107_v10 = vld [vmem:[%s2241_s5 + $0x100] sm:$0xff] }
 0x157   :  { %1607 = vmatprep.subr.bf16.mxu1 %v1606_v13  ;;  %v1642_v12 = vpack.c.bf16 %v1108_v11, %v1107_v10 }
 0x15a   :  { %1609 = vmatpush3.bf16.msra.mxu1 %v1606_v13 }
 0x15b   :  { %1611 = vmatprep.subr.bf16.mxu1 %v1610_v16 }
 0x1f7   :  { %v501_v17 = vpop.f32.mrb[4].mxu0 }
 0x1f8   :  { %v505_v18 = vmul.f32 0.001953125, %v501_v17  ;;  %v1356_v19 = vpop.f32.mrb[5].mxu0 }
 0x1fa   :  { %v506_v20 = vmul.f32 %v505_v18, %v505_v18 }
 0x1fc   :  { %v508_v21 = vrot.slane %v506_v20, 7  ;;  %v1111_v20 = vld [vmem:[%s2241_s5 + $0x120] sm:$0xff] }
 0x1fe   :  { %v510_v22 = vsub.f32 %v505_v18, %v508_v21  ;;  %v1112_v21 = vld [vmem:[%s2241_s5 + $0x128] sm:$0xff] }
 0x200   :  { %v511_v25 = vmax.f32 %v510_v22, 0.0 }
 0x202   :  { %v512_v26 = vadd.f32 1e-05, %v511_v25 }
 0x204   :  { %1718 = vrsqrt.f32 %v512_v26  ;;  %v1650_v26 = vpack.c.bf16 %v1112_v21, %v1111_v20 }
 0x20e   :  { %v1719_v35 = vpop.eup %1718 }
 0x20f   :  { %v521_v36 = vrot.slane %v1719_v35, %v2068_v34  ;;  %v1115_v35 = vld [vmem:[%s2241_s5 + $0x140] sm:$0xff] }
 0x211   :  { %v522_v37 = vcombine.high %v521_v36, %v521_v36  ;;  %v1116_v36 = vld [vmem:[%s2241_s5 + $0x148] sm:$0xff] }
 0x213   :  { %v529_v39 = vrot.slane %v522_v37, %v2068_v34  ;;  %v1658_v37 = vpack.c.bf16 %v1116_v36, %v1115_v35  ;;  %v902_v35 = vld [vmem:[%s2245_s7] sm:$0x1] }
 0x215   :  { %v531_v41 = vmul.f32 %v529_v39, %v390_v38  ;;  %v1117_v38 = vld [vmem:[%s2241_s5 + $0x150] sm:$0xff]  ;;  %v1118_v39 = vld [vmem:[%s2241_s5 + $0x158] sm:$0xff] }
 0x217   :  { %v532_v43 = vmul.f32 %v531_v41, %v505_v18  ;;  %v538_v44 = vrot.slane %v531_v41, %v2075_v40  ;;  %v1662_v41 = vpack.c.bf16 %v1118_v39, %v1117_v38  ;;  %v903_v38 = vld [vmem:[%s2246_s8] sm:$0x1] }
 0x219   :  { %v533_v45 = vsub.f32 %v391_v42, %v532_v43  ;;  %v540_v47 = vmul.f32 %v538_v44, %v1981_v24  ;;  %v541_v48 = vmul.f32 %v538_v44, %v1979_v23  ;;  %v542_v53 = vmul.f32 %v538_v44, %v1991_v33  ;;  %v587_v23 = vld [vmem:[%s2241_s5 + $0x20] sm:$0xff]  ;;  %v1120_v43 = vld [vmem:[%s2241_s5 + $0x168] sm:$0xff] }
 0x21a   :  { %v543_v56 = vmul.f32 %v538_v44, %v1989_v32  ;;  %v1618_v58 = vpack.c.bf16 %v588_v55, %v587_v23  ;;  %v590_v32 = vld [vmem:[%s2241_s5 + $0x38] sm:$0xff]  ;;  %v1119_v42 = vld [vmem:[%s2241_s5 + $0x160] sm:$0xff] }
 0x21b   :  { %v548_v46 = vrot.slane %v533_v45, %v2075_v40  ;;  %v1622_v61 = vpack.c.bf16 %v590_v32, %v589_v60  ;;  %v1666_v44 = vpack.c.bf16 %v1120_v43, %v1119_v42  ;;  %v1121_v45 = vld [vmem:[%s2241_s5 + $0x170] sm:$0xff] }
 0x21d   :  { %v2090_v51 = vadd.f32 %v548_v46, %v540_v47  ;;  %v2092_v52 = vadd.f32 %v548_v46, %v541_v48  ;;  %v2096_v24 = vadd.f32 %v548_v46, %v542_v53  ;;  %v2107_v33 = vadd.f32 %v548_v46, %v543_v56  ;;  %v1122_v46 = vld [vmem:[%s2241_s5 + $0x178] sm:$0xff] }
 0x21e   :  { %v1670_v47 = vpack.c.bf16 %v1122_v46, %v1121_v45 }
 0x21f   :  { %1389 = vmatprep.mubr.f32.mxu1 %v2090_v51  ;;  %v559_v59 = vrot.slane %v2090_v51, 7  ;;  %v560_v13 = vrot.slane %v2092_v52, 7  ;;  %v562_v18 = vrot.slane %v2096_v24, 7  ;;  %v563_v19 = vrot.slane %v2107_v33, 7 }
 0x220   :  { %1390 = vmatmul.mubr.f32.vlgmr.msra.gmra.mrb[0].mxu1 %v2092_v52  ;;  %v571_v22 = vrot.slane %v2090_v51, 1  ;;  %v572_v25 = vrot.slane %v2092_v52, 1  ;;  %v574_v48 = vrot.slane %v2096_v24, 1  ;;  %v575_v49 = vrot.slane %v2107_v33, 1  ;;  %v1125_v51 = vld [vmem:[%s2244_s6] ss:$0 sm:$0xff] }
 0x221   :  { %1613 = vmatpush3.bf16.msra.mxu1 %v1610_v16  ;;  %1392 = vmatprep.mubr.f32.mxu1 %v2096_v24  ;;  %v1646_v16 = vpack.c.bf16 %v1110_v15, %v1109_v14  ;;  %v561_v17 = vsel %vm44_vm1, %v559_v59, %v560_v13  ;;  %v564_v27 = vsel %vm44_vm1, %v562_v18, %v563_v19 }
 0x222   :  { %1615 = vmatprep.subr.bf16.mxu1 %v1614_v54  ;;  %v573_v30 = vsel %vm55_vm2, %v571_v22, %v572_v25  ;;  %v576_v50 = vsel %vm55_vm2, %v574_v48, %v575_v49 }
 0x224   :  { %1393 = vmatmul.mubr.f32.gmra.mrb[2].mxu1 %v2107_v33 }
 0x225   :  { %1617 = vmatpush3.bf16.msra.mxu1 %v1614_v54  ;;  %1427 = vmatprep.mubr.msk.f32.mxu1 %vm2110_vm4, %v559_v59 }
 0x226   :  { %1619 = vmatprep.subr.bf16.mxu1 %v1618_v58 }
 0x229   :  { %1621 = vmatpush3.bf16.msra.mxu1 %v1618_v58 }
 0x22a   :  { %1623 = vmatprep.subr.bf16.mxu1 %v1622_v61 }
 0x22d   :  { %1625 = vmatpush3.bf16.msra.mxu1 %v1622_v61 }
 0x22e   :  { %1627 = vmatprep.subr.bf16.mxu1 %v1626_v0 }
 0x231   :  { %1629 = vmatpush3.bf16.msra.mxu1 %v1626_v0 }
 0x232   :  { %1631 = vmatprep.subr.bf16.mxu1 %v1630_v3 }
 0x235   :  { %1633 = vmatpush3.bf16.msra.mxu1 %v1630_v3 }
 0x236   :  { %1635 = vmatprep.subr.bf16.mxu1 %v1634_v6 }
 0x239   :  { %1637 = vmatpush3.bf16.msra.mxu1 %v1634_v6 }
 0x23a   :  { %1639 = vmatprep.subr.bf16.mxu1 %v1638_v9 }
 0x23d   :  { %1641 = vmatpush3.bf16.msra.mxu1 %v1638_v9 }
 0x23e   :  { %1643 = vmatprep.subr.bf16.mxu1 %v1642_v12 }
 0x240   :  { %1428 = vmatmul.mubr.f32.vlgmr.msra.gmra.mrb[0].mxu1 %v561_v17 }
 0x241   :  { %1430 = vmatprep.mubr.msk.f32.mxu1 %vm2110_vm4, %v562_v18  ;;  %1645 = vmatpush3.bf16.msra.mxu1 %v1642_v12 }
 0x242   :  { %1647 = vmatprep.subr.bf16.mxu1 %v1646_v16 }
 0x244   :  { %1431 = vmatmul.mubr.f32.gmra.mrb[2].mxu1 %v564_v27 }
 0x245   :  { %1649 = vmatpush3.bf16.msra.mxu1 %v1646_v16  ;;  %1465 = vmatprep.mubr.f32.mxu1 %v573_v30 }
 0x246   :  { %1651 = vmatprep.subr.bf16.mxu1 %v1650_v26 }
 0x249   :  { %1653 = vmatpush3.bf16.msra.mxu1 %v1650_v26 }
 0x24a   :  { %1655 = vmatprep.subr.bf16.mxu1 %v1654_v31 }
 0x24d   :  { %1657 = vmatpush3.bf16.msra.mxu1 %v1654_v31 }
 0x24e   :  { %1659 = vmatprep.subr.bf16.mxu1 %v1658_v37 }
 0x251   :  { %1661 = vmatpush3.bf16.msra.mxu1 %v1658_v37 }
 0x252   :  { %1663 = vmatprep.subr.bf16.mxu1 %v1662_v41 }
 0x255   :  { %1665 = vmatpush3.bf16.msra.mxu1 %v1662_v41 }
 0x256   :  { %1667 = vmatprep.subr.bf16.mxu1 %v1666_v44 }
 0x259   :  { %1669 = vmatpush3.bf16.msra.mxu1 %v1666_v44 }
 0x25a   :  { %1671 = vmatprep.subr.bf16.mxu1 %v1670_v47 }
 0x25d   :  { %1673 = vmatpush3.bf16.msra.mxu1 %v1670_v47 }
 0x260   :  { %1466 = vmatmul.mubr.msk.f32.vlgmr.msra.gmra.mrb[0].mxu1 %vm55_vm2, %v572_v25 }
 0x261   :  { %1468 = vmatprep.mubr.f32.mxu1 %v576_v50 }
 0x264   :  { %1469 = vmatmul.mubr.msk.f32.gmra.mrb[2].mxu1 %vm55_vm2, %v575_v49 }
 0x333   :  { %v1467_v52 = vpop.f32.mrb[0].mxu1 }
 0x334   :  { %v899_v53 = vadd.f32 %v1467_v52, %v1125_v51  ;;  %v869_v54 = vpop.f32.mrb[1].mxu1 }
 0x335   :  { %v898_v23 = vadd.f32 %v1125_v51, %v869_v54 }
 0x336   :  { %v905_v55 = vmax.f32 %v899_v53, 0.0 }
 0x337   :  { %v904_v24 = vmax.f32 %v898_v23, 0.0  ;;  %v1470_v56 = vpop.f32.mrb[2].mxu1 }
 0x338   :  { %v901_v33 = vadd.f32 %v1470_v56, %v1125_v51  ;;  %v879_v57 = vpop.f32.mrb[3].mxu1  ;;  %v918_v58 = vmul.f32 %v905_v55, %v905_v55 }
 0x339   :  { %v917_v59 = vmul.f32 %v904_v24, %v904_v24  ;;  %v900_v60 = vadd.f32 %v1125_v51, %v879_v57  ;;  %v908_v32 = vadd.f32 %v905_v55, %v904_v24 }
 0x33a   :  { %v907_v61 = vmax.f32 %v901_v33, 0.0 }
 0x33b   :  { %v906_v62 = vmax.f32 %v900_v60, 0.0  ;;  %v921_v63 = vadd.f32 %v918_v58, %v917_v59 }
 0x33c   :  { %v920_v2 = vmul.f32 %v907_v61, %v907_v61 }
 0x33d   :  { %v909_v0 = vadd.f32 %v908_v32, %v906_v62  ;;  %v919_v1 = vmul.f32 %v906_v62, %v906_v62 }
 0x33f   :  { %v910_v3 = vadd.f32 %v909_v0, %v907_v61  ;;  %v922_v4 = vadd.f32 %v921_v63, %v919_v1 }
 0x341   :  { %v911_v5 = vrot.slane %v910_v3, 4  ;;  %v923_v6 = vadd.f32 %v922_v4, %v920_v2 }
 0x343   :  { %v912_v7 = vadd.f32 %v911_v5, %v910_v3  ;;  %v924_v8 = vrot.slane %v923_v6, 4 }
 0x345   :  { %v913_v9 = vrot.slane %v912_v7, 2  ;;  %v925_v10 = vadd.f32 %v924_v8, %v923_v6 }
 0x347   :  { %v914_v11 = vadd.f32 %v913_v9, %v912_v7  ;;  %v926_v12 = vrot.slane %v925_v10, 2 }
 0x349   :  { %v915_v13 = vrot.slane %v914_v11, 1  ;;  %v927_v14 = vadd.f32 %v926_v12, %v925_v10 }
 0x34b   :  { %v928_v15 = vrot.slane %v927_v14, 1  ;;  %v916_v16 = vadd.f32 %v915_v13, %v914_v11 }
 0x34d   :  { %v929_v17 = vadd.f32 %v928_v15, %v927_v14 }
 0x34f   :  { %v930_v18 = vsel %vm44_vm1, %v916_v16, %v929_v17 }
 0x350   :  { %1504 = vmatmul.mubr.f32.vlgmr.msra.gmra.mrb[6].mxu0 %v930_v18 }
 0x423   :  { %v997_v19 = vpop.f32.mrb[6].mxu0 }
 0x424   :  { %v1001_v20 = vmul.f32 0.001953125, %v997_v19  ;;  %v1505_v21 = vpop.f32.mrb[7].mxu0 }
 0x426   :  { %v1002_v22 = vmul.f32 %v1001_v20, %v1001_v20 }
 0x428   :  { %v1004_v25 = vrot.slane %v1002_v22, 7 }
 0x42a   :  { %v1006_v26 = vsub.f32 %v1001_v20, %v1004_v25 }
 0x42c   :  { %v1007_v27 = vmax.f32 %v1006_v26, 0.0 }
 0x42e   :  { %v1008_v28 = vadd.f32 1e-05, %v1007_v27 }
 0x430   :  { %1720 = vrsqrt.f32 %v1008_v28 }
 0x43a   :  { %v1721_v29 = vpop.eup %1720 }
 0x43b   :  { %v1017_v30 = vrot.slane %v1721_v29, %v2068_v34 }
 0x43d   :  { %v1018_v31 = vcombine.high %v1017_v30, %v1017_v30 }
 0x43f   :  { %v1025_v36 = vrot.slane %v1018_v31, %v2068_v34 }
 0x441   :  { %v1027_v37 = vmul.f32 %v1025_v36, %v902_v35 }
 0x443   :  { %v1028_v39 = vmul.f32 %v1027_v37, %v1001_v20  ;;  %v1034_v41 = vrot.slane %v1027_v37, %v2075_v40 }
 0x445   :  { %v1029_v42 = vsub.f32 %v903_v38, %v1028_v39  ;;  %v1036_v43 = vmul.f32 %v1034_v41, %v904_v24  ;;  %v1037_v44 = vmul.f32 %v1034_v41, %v905_v55  ;;  %v1038_v45 = vmul.f32 %v1034_v41, %v906_v62 }
 0x446   :  { %v1039_v46 = vmul.f32 %v1034_v41, %v907_v61 }
 0x447   :  { %v1044_v47 = vrot.slane %v1029_v42, %v2075_v40 }
 0x449   :  { %v1046_v48 = vadd.f32 %v1044_v47, %v1036_v43  ;;  %v1047_v49 = vadd.f32 %v1044_v47, %v1037_v44  ;;  %v1048_v50 = vadd.f32 %v1044_v47, %v1038_v45  ;;  %v1049_v51 = vadd.f32 %v1044_v47, %v1039_v46 }
 0x44b   :  { %1050 = vst [vmem:[%s2247_s10] sm:$0xff] %v1046_v48  ;;  %1051 = vst [vmem:[%s2247_s10 + $0x8] sm:$0xff] %v1047_v49 }
 0x44c   :  { %1052 = vst [vmem:[%s2247_s10 + $0x10] sm:$0xff] %v1048_v50  ;;  %1053 = vst [vmem:[%s2247_s10 + $0x18] sm:$0xff] %v1049_v51 }

</bundles_post_ra>
